<compile_context>
chip_gen: v7x
topology: tpu7x:2x2x1
jax: 0.10.0
libtpu: 0.0.40
codegen_flags: <defaults>
</compile_context>

<pallas_src>
import jax
import jax.numpy as jnp
from jax.experimental import pallas as pl
from jax.experimental.pallas import tpu as pltpu

_LANES = 128  # vreg lane width; batch tiles are multiples of this


def _round_up(n, m):
    return ((n + m - 1) // m) * m


def _choose_block_b(batch, d):
    """Default batch-tile size (rows per grid step).

    Per-step f32 VMEM footprint ~= 2*(d*TB*4) [double-buffered x tile]
      + 64*TB*4 [h1] + 32*TB*4 [h2] + 2*(TB*4) [double-buffered out]
      = TB * (2*d + 64 + 32 + 2) * 4 bytes.
    Keep that under ~16 MiB so it is safe on every generation (v7x scoped VMEM
    default is 32 MiB of only 64 MiB physical), and keep >= 2 grid steps for
    mid-size batches so the "parallel" axis lands on both v7x TensorCores.
    """
    per_row_bytes = (2 * d + 64 + 32 + 2) * 4
    vmem_cap_rows = (16 * 1024 * 1024) // per_row_bytes
    bb = min(8192, (vmem_cap_rows // _LANES) * _LANES)
    bb = max(bb, _LANES)
    two_way = _round_up(pl.cdiv(batch, 2), _LANES)   # ensure >=2 steps when possible
    return max(_LANES, min(bb, two_way))


def _mlp_kernel(x_ref, w1_ref, b1_ref, w2_ref, b2_ref, w3_ref, b3_ref, o_ref):
    # x tile: (TB, D) - batch on sublanes, native PyTorch layout, no transpose.
    x = x_ref[...]

    # Layer 1: (TB, D) @ (D, 64) -> (TB, 64)   (MXU, f32 accumulation)
    h1 = jnp.dot(x, w1_ref[...], preferred_element_type=jnp.float32)
    h1 = jnp.maximum(h1 + b1_ref[...], 0.0)          # bias (1, 64) broadcasts over rows

    # Layer 2: (TB, 64) @ (64, 32) -> (TB, 32)
    h2 = jnp.dot(h1, w2_ref[...], preferred_element_type=jnp.float32)
    h2 = jnp.maximum(h2 + b2_ref[...], 0.0)

    # Layer 3 (out_features = 1): VPU multiply by the (1, 32) weight row + lane
    # (XLU) reduction instead of a 1-wide MXU matmul.
    h3 = jnp.sum(h2 * w3_ref[...], axis=1, keepdims=True) + b3_ref[...]   # (TB, 1)

    # Sigmoid on the EUP.
    o_ref[...] = jax.nn.sigmoid(h3).astype(o_ref.dtype)


def reward_predictor_forward(x, params, *, block_b=None):
    """Fused RewardPredictor forward pass on TPU.

    x      : (batch, obs_size + act_size) float32 (native PyTorch layout).
    params : (w1, b1, w2, b2, w3, b3) with
             w1 (D, 64), w2 (64, 32) stored (in, out);
             w3 (1, 32) stored (out, in) so it broadcast-multiplies h2;
             biases b1 (1, 64), b2 (1, 32), b3 (1, 1).
    Returns: (batch, 1) float32, matching the nn.Module output.
    """
    w1, b1, w2, b2, w3, b3 = params
    B, D = x.shape
    assert w1.shape == (D, 64), (w1.shape, D)
    assert b1.shape == (1, 64), b1.shape
    assert w2.shape == (64, 32), w2.shape
    assert b2.shape == (1, 32), b2.shape
    assert w3.shape == (1, 32), w3.shape
    assert b3.shape == (1, 1), b3.shape

    if block_b is None:
        block_b = _choose_block_b(B, D)
    block_b = _round_up(block_b, _LANES)
    n_blocks = pl.cdiv(B, block_b)   # ragged tail handled by the boundary block

    # Weights/biases: full-array blocks with a constant index_map -> VMEM-resident
    # across all grid steps (no re-DMA).
    resident = lambda a: pl.BlockSpec(a.shape, lambda i: (0, 0))

    return pl.pallas_call(
        _mlp_kernel,
        out_shape=jax.ShapeDtypeStruct((B, 1), jnp.float32),
        grid=(n_blocks,),
        in_specs=[
            pl.BlockSpec((block_b, D), lambda i: (i, 0)),   # x, tiled along batch
            resident(w1), resident(b1),
            resident(w2), resident(b2),
            resident(w3), resident(b3),
        ],
        out_specs=pl.BlockSpec((block_b, 1), lambda i: (i, 0)),
        compiler_params=pltpu.CompilerParams(
            dimension_semantics=("parallel",)),             # v7x: shard tiles over 2 TCs
    )(x, w1, b1, w2, b2, w3, b3)


def init_params(key, obs_size, act_size):
    """PyTorch nn.Linear default init: W, b ~ U(-1/sqrt(fan_in), 1/sqrt(fan_in)),
    emitted directly in the layout the kernel consumes (see reward_predictor_forward)."""
    D = obs_size + act_size
    dims = [(D, 64), (64, 32), (32, 1)]
    params = []
    for idx, (fan_in, fan_out) in enumerate(dims):
        key, kw, kb = jax.random.split(key, 3)
        bound = 1.0 / (float(fan_in) ** 0.5)
        if idx < 2:
            w = jax.random.uniform(kw, (fan_in, fan_out), jnp.float32, -bound, bound)
        else:  # final layer kept (out, in) = (1, 32) for the broadcast-multiply epilogue
            w = jax.random.uniform(kw, (fan_out, fan_in), jnp.float32, -bound, bound)
        b = jax.random.uniform(kb, (1, fan_out), jnp.float32, -bound, bound)
        params.extend([w, b])
    return tuple(params)


def reference_forward(x, params):
    """Pure-JAX reference (same param layout) for correctness checking."""
    w1, b1, w2, b2, w3, b3 = params
    h = jnp.maximum(x @ w1 + b1, 0.0)
    h = jnp.maximum(h @ w2 + b2, 0.0)
    return jax.nn.sigmoid(h @ w3.T + b3)


if __name__ == "__main__":
    obs_size, act_size = 16, 16
    D = obs_size + act_size

    key = jax.random.PRNGKey(0)
    key, kx = jax.random.split(key)
    params = init_params(key, obs_size, act_size)

    # Tolerance note (per review): the kernel's f32 MXU matmuls and the XLA
    # reference may use different bf16-pass decompositions under default matmul
    # precision, so we allow ~1e-3; real layout/indexing bugs show up as O(0.1+).
    ATOL = RTOL = 1e-3

    # Small batch: single grid step; the 8-row batch is handled by one (masked)
    # boundary block -- no host-side pad.
    x_small = jax.random.normal(kx, (8, D), dtype=jnp.float32)
    out_small = jax.block_until_ready(reward_predictor_forward(x_small, params))
    assert out_small.shape == (8, 1)
    assert jnp.allclose(out_small, reference_forward(x_small, params),
                        atol=ATOL, rtol=RTOL), "small-batch mismatch vs reference"

    # Larger, non-multiple batch with an explicit 128-row tile: exercises grid > 1,
    # VMEM-resident weight index_maps, and the ragged-tail boundary block.
    key, kx2 = jax.random.split(key)
    x_big = jax.random.normal(kx2, (300, D), dtype=jnp.float32)
    out_big = jax.block_until_ready(
        reward_predictor_forward(x_big, params, block_b=128))
    assert out_big.shape == (300, 1)
    assert jnp.allclose(out_big, reference_forward(x_big, params),
                        atol=ATOL, rtol=RTOL), "multi-tile mismatch vs reference"

    print("KERNEL_OK")
</pallas_src>

<mosaic_0001>
module attributes {stable_mosaic.version = 11 : i64} {
  func.func @_mlp_kernel(%arg0: i32, %arg1: memref<128x32xf32, #tpu.memory_space<vmem>>, %arg2: memref<32x64xf32, #tpu.memory_space<vmem>>, %arg3: memref<1x64xf32, #tpu.memory_space<vmem>>, %arg4: memref<64x32xf32, #tpu.memory_space<vmem>>, %arg5: memref<1x32xf32, #tpu.memory_space<vmem>>, %arg6: memref<1x32xf32, #tpu.memory_space<vmem>>, %arg7: memref<1x1xf32, #tpu.memory_space<vmem>>, %arg8: memref<128x1xf32, #tpu.memory_space<vmem>>) attributes {dimension_semantics = [#tpu.dimension_semantics<parallel>], iteration_bounds = array<i64: 1>, scalar_prefetch = 0 : i64, scratch_operands = 0 : i64, tpu.core_type = #tpu.core_type<tc>, window_params = [{transform_indices = @transform_0, window_bounds = array<i64: 128, 32>}, {pipeline_mode = #tpu.pipeline_mode<synchronous>, transform_indices = @transform_1, window_bounds = array<i64: 32, 64>}, {pipeline_mode = #tpu.pipeline_mode<synchronous>, transform_indices = @transform_2, window_bounds = array<i64: 1, 64>}, {pipeline_mode = #tpu.pipeline_mode<synchronous>, transform_indices = @transform_3, window_bounds = array<i64: 64, 32>}, {pipeline_mode = #tpu.pipeline_mode<synchronous>, transform_indices = @transform_4, window_bounds = array<i64: 1, 32>}, {pipeline_mode = #tpu.pipeline_mode<synchronous>, transform_indices = @transform_5, window_bounds = array<i64: 1, 32>}, {pipeline_mode = #tpu.pipeline_mode<synchronous>, transform_indices = @transform_6, window_bounds = array<i64: 1, 1>}, {transform_indices = @transform_7, window_bounds = array<i64: 128, 1>}]} {
    %c0 = arith.constant 0 : index
    %c0_0 = arith.constant 0 : index
    %0 = vector.load %arg1[%c0, %c0_0] : memref<128x32xf32, #tpu.memory_space<vmem>>, vector<128x32xf32>
    %c0_1 = arith.constant 0 : index
    %c0_2 = arith.constant 0 : index
    %1 = vector.load %arg2[%c0_1, %c0_2] : memref<32x64xf32, #tpu.memory_space<vmem>>, vector<32x64xf32>
    %cst = arith.constant dense<0.000000e+00> : vector<128x64xf32>
    %2 = tpu.matmul %0, %1, %cst {dimension_numbers = #tpu.dot_dimension_numbers<[1], [0], [0], [1], [0, 0, 1, 1], [], []>} : vector<128x32xf32>, vector<32x64xf32>, vector<128x64xf32> -> vector<128x64xf32>
    %c0_3 = arith.constant 0 : index
    %c0_4 = arith.constant 0 : index
    %3 = vector.load %arg3[%c0_3, %c0_4] : memref<1x64xf32, #tpu.memory_space<vmem>>, vector<1x64xf32>
    %4 = vector.broadcast %3 : vector<1x64xf32> to vector<128x64xf32>
    %5 = arith.addf %2, %4 : vector<128x64xf32>
    %cst_5 = arith.constant 0.000000e+00 : f32
    %6 = vector.broadcast %cst_5 : f32 to vector<128x64xf32>
    %7 = arith.maximumf %5, %6 : vector<128x64xf32>
    %c0_6 = arith.constant 0 : index
    %c0_7 = arith.constant 0 : index
    %8 = vector.load %arg4[%c0_6, %c0_7] : memref<64x32xf32, #tpu.memory_space<vmem>>, vector<64x32xf32>
    %cst_8 = arith.constant dense<0.000000e+00> : vector<128x32xf32>
    %9 = tpu.matmul %7, %8, %cst_8 {dimension_numbers = #tpu.dot_dimension_numbers<[1], [0], [0], [1], [0, 0, 1, 1], [], []>} : vector<128x64xf32>, vector<64x32xf32>, vector<128x32xf32> -> vector<128x32xf32>
    %c0_9 = arith.constant 0 : index
    %c0_10 = arith.constant 0 : index
    %10 = vector.load %arg5[%c0_9, %c0_10] : memref<1x32xf32, #tpu.memory_space<vmem>>, vector<1x32xf32>
    %11 = vector.broadcast %10 : vector<1x32xf32> to vector<128x32xf32>
    %12 = arith.addf %9, %11 : vector<128x32xf32>
    %cst_11 = arith.constant 0.000000e+00 : f32
    %13 = vector.broadcast %cst_11 : f32 to vector<128x32xf32>
    %14 = arith.maximumf %12, %13 : vector<128x32xf32>
    %c0_12 = arith.constant 0 : index
    %c0_13 = arith.constant 0 : index
    %15 = vector.load %arg6[%c0_12, %c0_13] : memref<1x32xf32, #tpu.memory_space<vmem>>, vector<1x32xf32>
    %16 = vector.broadcast %15 : vector<1x32xf32> to vector<128x32xf32>
    %17 = arith.mulf %14, %16 : vector<128x32xf32>
    %cst_14 = arith.constant dense<0.000000e+00> : vector<128xf32>
    %18 = vector.multi_reduction <add>, %17, %cst_14 [1] : vector<128x32xf32> to vector<128xf32>
    %19 = vector.shape_cast %18 : vector<128xf32> to vector<128x1xf32>
    %c0_15 = arith.constant 0 : index
    %c0_16 = arith.constant 0 : index
    %20 = vector.load %arg7[%c0_15, %c0_16] : memref<1x1xf32, #tpu.memory_space<vmem>>, vector<1x1xf32>
    %21 = vector.broadcast %20 : vector<1x1xf32> to vector<128x1xf32>
    %22 = arith.addf %19, %21 : vector<128x1xf32>
    %23 = arith.negf %22 : vector<128x1xf32>
    %24 = math.exp %23 : vector<128x1xf32>
    %cst_17 = arith.constant 1.000000e+00 : f32
    %25 = vector.broadcast %cst_17 : f32 to vector<128x1xf32>
    %26 = arith.addf %25, %24 : vector<128x1xf32>
    %27 = arith.divf %25, %26 : vector<128x1xf32>
    %c0_18 = arith.constant 0 : index
    %c0_19 = arith.constant 0 : index
    %28 = vector.load %arg8[%c0_18, %c0_19] : memref<128x1xf32, #tpu.memory_space<vmem>>, vector<128x1xf32>
    tpu.vector_store %arg8[%c0_18, %c0_19], %27 {strides = array<i32>} : memref<128x1xf32, #tpu.memory_space<vmem>>, vector<128x1xf32>,
    return
  }
  func.func @transform_0(%arg0: i32) -> (i32, i32) {
    %c0_i32 = arith.constant 0 : i32
    %c0_i32_0 = arith.constant 0 : i32
    return %arg0, %c0_i32 : i32, i32
  }
  func.func @transform_1(%arg0: i32) -> (i32, i32) {
    %c0_i32 = arith.constant 0 : i32
    %c0_i32_0 = arith.constant 0 : i32
    %c0_i32_1 = arith.constant 0 : i32
    return %c0_i32, %c0_i32_0 : i32, i32
  }
  func.func @transform_2(%arg0: i32) -> (i32, i32) {
    %c0_i32 = arith.constant 0 : i32
    %c0_i32_0 = arith.constant 0 : i32
    %c0_i32_1 = arith.constant 0 : i32
    return %c0_i32, %c0_i32_0 : i32, i32
  }
  func.func @transform_3(%arg0: i32) -> (i32, i32) {
    %c0_i32 = arith.constant 0 : i32
    %c0_i32_0 = arith.constant 0 : i32
    %c0_i32_1 = arith.constant 0 : i32
    return %c0_i32, %c0_i32_0 : i32, i32
  }
  func.func @transform_4(%arg0: i32) -> (i32, i32) {
    %c0_i32 = arith.constant 0 : i32
    %c0_i32_0 = arith.constant 0 : i32
    %c0_i32_1 = arith.constant 0 : i32
    return %c0_i32, %c0_i32_0 : i32, i32
  }
  func.func @transform_5(%arg0: i32) -> (i32, i32) {
    %c0_i32 = arith.constant 0 : i32
    %c0_i32_0 = arith.constant 0 : i32
    %c0_i32_1 = arith.constant 0 : i32
    return %c0_i32, %c0_i32_0 : i32, i32
  }
  func.func @transform_6(%arg0: i32) -> (i32, i32) {
    %c0_i32 = arith.constant 0 : i32
    %c0_i32_0 = arith.constant 0 : i32
    %c0_i32_1 = arith.constant 0 : i32
    return %c0_i32, %c0_i32_0 : i32, i32
  }
  func.func @transform_7(%arg0: i32) -> (i32, i32) {
    %c0_i32 = arith.constant 0 : i32
    %c0_i32_0 = arith.constant 0 : i32
    return %arg0, %c0_i32 : i32, i32
  }
}

</mosaic_0001>

<bundles_post_ra>
// kernel: tpu_custom_call.1
= control target key start
LH: loop header
LB: loop body
LE: loop exit
PB: predicated region body
PF: predicated region fallthrough
CT: control target
= control target key end

     0   :  { %s1243_s0 = inlined_call_operand.vmem [shape: f32[8,32], index: 0, kind: input, shape index: {}]   ;;  %s1244_s1 = inlined_call_operand.vmem [shape: f32[32,64], index: 1, kind: input, shape index: {}]   ;;  %s1245_s2 = inlined_call_operand.vmem [shape: f32[1,64], index: 2, kind: input, shape index: {}]   ;;  %s1246_s3 = inlined_call_operand.vmem [shape: f32[64,32], index: 3, kind: input, shape index: {}]   ;;  %s1247_s4 = inlined_call_operand.vmem [shape: f32[1,32], index: 4, kind: input, shape index: {}]   ;;  %s1248_s5 = inlined_call_operand.vmem [shape: f32[1,32], index: 5, kind: input, shape index: {}]   ;;  %s1249_s6 = inlined_call_operand.<no memory space> [shape: f32[1,1], index: 6, kind: input, shape index: {}]   ;;  %s1250_s7 = inlined_call_operand.vmem [shape: f32[8,1], index: 7, kind: output, shape index: {}]  }
   0x1   :  { %v12_v0 = vstv %s1249_s6 }
   0x2   :  { %13 = vst [vmem:[#allocation2] sm:$0x1] %v12_v0 }
   0x3   :  { %v44_v1 = vld [vmem:[%s1244_s1] sm:$0xff]  ;;  %v45_v2 = vld [vmem:[%s1244_s1 + $0x8] sm:$0xff]  ;;  %v46_v3 = vld [vmem:[%s1244_s1 + $0x10] sm:$0xff]  ;;  %vm55_vm0 = vcmask 261120   ;;  %vm280_vm1 = vcmask 523264   ;;  %vm680_vm2 = vcmask 7168  }
   0x4   :  { %v905_v4 = vpack.c.bf16 %v45_v2, %v44_v1  ;;  %v47_v5 = vld [vmem:[%s1244_s1 + $0x18] sm:$0xff]  ;;  %v28_v6 = vld [vmem:[%s1243_s0] sm:$0xff]  ;;  %v266_v9 = vld [vmem:[%s1246_s3 + $0x8] sm:$0xff] }
   0x5   :  { %v909_v7 = vpack.c.bf16 %v47_v5, %v46_v3  ;;  %841 = vmatprep.mubr.msk.f32.mxu0 %vm55_vm0, %v28_v6  ;;  %v265_v8 = vld [vmem:[%s1246_s3] sm:$0xff]  ;;  %v267_v10 = vld [vmem:[%s1246_s3 + $0x10] sm:$0xff]  ;;  %v268_v11 = vld [vmem:[%s1246_s3 + $0x18] sm:$0xff] }
   0x6   :  { %906 = vmatprep.subr.bf16.mxu0 %v905_v4  ;;  %v29_v12 = vld [vmem:[%s1243_s0 + $0x8] sm:$0xff]  ;;  %v913_v13 = vpack.c.bf16 %v266_v9, %v265_v8  ;;  %v30_v14 = vld [vmem:[%s1243_s0 + $0x10] sm:$0xff]  ;;  %v917_v15 = vpack.c.bf16 %v268_v11, %v267_v10  ;;  %v269_v16 = vld [vmem:[%s1246_s3 + $0x20] sm:$0xff] }
   0x7   :  { %908 = vmatpush3.bf16.msra.mxu0 %v905_v4  ;;  %v270_v17 = vld [vmem:[%s1246_s3 + $0x28] sm:$0xff]  ;;  %v31_v18 = vld [vmem:[%s1243_s0 + $0x18] sm:$0xff]  ;;  %v32_v19 = vld [vmem:[%s1243_s0 + $0x20] sm:$0xff] }
   0x8   :  { %910 = vmatprep.subr.bf16.mxu0 %v909_v7  ;;  %929 = vmatprep.subr.bf16.mxu1 %v913_v13  ;;  %v921_v20 = vpack.c.bf16 %v270_v17, %v269_v16  ;;  %v33_v21 = vld [vmem:[%s1243_s0 + $0x28] sm:$0xff]  ;;  %v34_v22 = vld [vmem:[%s1243_s0 + $0x30] sm:$0xff]  ;;  %v35_v23 = vld [vmem:[%s1243_s0 + $0x38] sm:$0xff] }
   0x9   :  { %933 = vmatpush3.bf16.msra.mxu1 %v913_v13  ;;  %v36_v24 = vld [vmem:[%s1243_s0 + $0x40] sm:$0xff]  ;;  %v37_v25 = vld [vmem:[%s1243_s0 + $0x48] sm:$0xff]  ;;  %v38_v26 = vld [vmem:[%s1243_s0 + $0x50] sm:$0xff] }
   0xa   :  { %930 = vmatprep.subr.bf16.mxu1 %v917_v15  ;;  %v39_v27 = vld [vmem:[%s1243_s0 + $0x58] sm:$0xff]  ;;  %v40_v28 = vld [vmem:[%s1243_s0 + $0x60] sm:$0xff]  ;;  %v41_v29 = vld [vmem:[%s1243_s0 + $0x68] sm:$0xff] }
   0xb   :  { %912 = vmatpush3.bf16.msra.mxu0 %v909_v7  ;;  %v42_v30 = vld [vmem:[%s1243_s0 + $0x70] sm:$0xff]  ;;  %v43_v31 = vld [vmem:[%s1243_s0 + $0x78] sm:$0xff]  ;;  %v737_v35 = vld [vmem:[%s1245_s2] ss:$0 sm:$0xff] }
   0xc   :  { %914 = vmatprep.subr.bf16.mxu0 %v913_v13  ;;  %v271_v32 = vld [vmem:[%s1246_s3 + $0x30] sm:$0xff]  ;;  %v272_v33 = vld [vmem:[%s1246_s3 + $0x38] sm:$0xff] }
   0xd   :  { %934 = vmatpush3.bf16.msra.mxu1 %v917_v15  ;;  %v925_v34 = vpack.c.bf16 %v272_v33, %v271_v32 }
   0xe   :  { %842 = vmatmul.mubr.msk.f32.vlgmr.msra.gmra.mrb[0].mxu0 %vm55_vm0, %v29_v12  ;;  %931 = vmatprep.subr.bf16.mxu1 %v921_v20 }
   0xf   :  { %844 = vmatprep.mubr.msk.f32.mxu0 %vm55_vm0, %v30_v14  ;;  %916 = vmatpush3.bf16.msra.mxu0 %v913_v13 }
  0x10   :  { %918 = vmatprep.subr.bf16.mxu0 %v917_v15 }
  0x11   :  { %935 = vmatpush3.bf16.msra.mxu1 %v921_v20 }
  0x12   :  { %845 = vmatmul.mubr.msk.f32.gmra.mrb[2].mxu0 %vm55_vm0, %v31_v18  ;;  %932 = vmatprep.subr.bf16.mxu1 %v925_v34 }
  0x13   :  { %847 = vmatprep.mubr.msk.f32.mxu0 %vm55_vm0, %v32_v19  ;;  %920 = vmatpush3.bf16.msra.mxu0 %v917_v15 }
  0x14   :  { %922 = vmatprep.subr.bf16.mxu0 %v921_v20 }
  0x15   :  { %936 = vmatpush3.bf16.msra.mxu1 %v925_v34 }
  0x16   :  { %848 = vmatmul.mubr.msk.f32.gmra.mrb[4].mxu0 %vm55_vm0, %v33_v21 }
  0x17   :  { %850 = vmatprep.mubr.msk.f32.mxu0 %vm55_vm0, %v34_v22  ;;  %924 = vmatpush3.bf16.msra.mxu0 %v921_v20  ;;  %v1166_v20 = vld [vmem:[%s1247_s4] ss:$0 sm:$0xff] }
  0x18   :  { %926 = vmatprep.subr.bf16.mxu0 %v925_v34 }
  0x1a   :  { %851 = vmatmul.mubr.msk.f32.gmra.mrb[6].mxu0 %vm55_vm0, %v35_v23 }
  0x1b   :  { %853 = vmatprep.mubr.msk.f32.mxu0 %vm55_vm0, %v36_v24  ;;  %928 = vmatpush3.bf16.msra.mxu0 %v925_v34 }
  0x1e   :  { %854 = vmatmul.mubr.msk.f32.gmra.mrb[8].mxu0 %vm55_vm0, %v37_v25  ;;  %v1173_v25 = vld [vmem:[%s1248_s5] ss:$0 sm:$0xff] }
  0x1f   :  { %856 = vmatprep.mubr.msk.f32.mxu0 %vm55_vm0, %v38_v26 }
  0x22   :  { %857 = vmatmul.mubr.msk.f32.gmra.mrb[10].mxu0 %vm55_vm0, %v39_v27 }
  0x23   :  { %859 = vmatprep.mubr.msk.f32.mxu0 %vm55_vm0, %v40_v28 }
  0x26   :  { %860 = vmatmul.mubr.msk.f32.gmra.mrb[12].mxu0 %vm55_vm0, %v41_v29 }
  0x27   :  { %862 = vmatprep.mubr.msk.f32.mxu0 %vm55_vm0, %v42_v30 }
  0x2a   :  { %863 = vmatmul.mubr.msk.f32.gmra.mrb[14].mxu0 %vm55_vm0, %v43_v31 }
  0xe1   :  { %v843_v36 = vpop.f32.mrb[0].mxu0 }
  0xe2   :  { %v176_v37 = vadd.f32 %v843_v36, %v737_v35  ;;  %v170_v38 = vpop.f32.mrb[1].mxu0 }
  0xe3   :  { %v171_v39 = vadd.f32 %v737_v35, %v170_v38 }
  0xe4   :  { %v250_v42 = vmax.f32 %v176_v37, 0.0 }
  0xe5   :  { %v249_v40 = vmax.f32 %v171_v39, 0.0  ;;  %v846_v41 = vpop.f32.mrb[2].mxu0 }
  0xe6   :  { %v186_v43 = vadd.f32 %v846_v41, %v737_v35  ;;  %v180_v44 = vpop.f32.mrb[3].mxu0 }
  0xe7   :  { %v181_v45 = vadd.f32 %v737_v35, %v180_v44  ;;  %881 = vmatprep.mubr.msk.f32.mxu0 %vm280_vm1, %v249_v40 }
  0xe8   :  { %882 = vmatmul.mubr.msk.f32.vlgmr.msra.gmra.mrb[16].mxu0 %vm280_vm1, %v250_v42  ;;  %v252_v48 = vmax.f32 %v186_v43, 0.0 }
  0xe9   :  { %v251_v46 = vmax.f32 %v181_v45, 0.0  ;;  %v849_v47 = vpop.f32.mrb[4].mxu0 }
  0xea   :  { %v196_v49 = vadd.f32 %v849_v47, %v737_v35  ;;  %v190_v50 = vpop.f32.mrb[5].mxu0 }
  0xeb   :  { %v191_v51 = vadd.f32 %v737_v35, %v190_v50  ;;  %884 = vmatprep.mubr.msk.f32.mxu1 %vm280_vm1, %v251_v46 }
  0xec   :  { %v254_v52 = vmax.f32 %v196_v49, 0.0  ;;  %885 = vmatmul.mubr.msk.f32.vlgmr.msra.gmra.mrb[0].mxu1 %vm280_vm1, %v252_v48 }
  0xed   :  { %v253_v53 = vmax.f32 %v191_v51, 0.0  ;;  %v852_v54 = vpop.f32.mrb[6].mxu0 }
  0xee   :  { %v206_v55 = vadd.f32 %v852_v54, %v737_v35  ;;  %v200_v56 = vpop.f32.mrb[7].mxu0 }
  0xef   :  { %v201_v57 = vadd.f32 %v737_v35, %v200_v56  ;;  %887 = vmatprep.mubr.msk.f32.mxu1 %vm280_vm1, %v253_v53 }
  0xf0   :  { %v256_v58 = vmax.f32 %v206_v55, 0.0  ;;  %888 = vmatmul.mubr.msk.f32.gmra.mrb[2].mxu1 %vm280_vm1, %v254_v52 }
  0xf1   :  { %v255_v59 = vmax.f32 %v201_v57, 0.0  ;;  %v855_v60 = vpop.f32.mrb[8].mxu0 }
  0xf2   :  { %v216_v61 = vadd.f32 %v855_v60, %v737_v35  ;;  %v210_v62 = vpop.f32.mrb[9].mxu0 }
  0xf3   :  { %v211_v63 = vadd.f32 %v737_v35, %v210_v62  ;;  %890 = vmatprep.mubr.msk.f32.mxu1 %vm280_vm1, %v255_v59 }
  0xf4   :  { %v258_v0 = vmax.f32 %v216_v61, 0.0  ;;  %891 = vmatmul.mubr.msk.f32.gmra.mrb[4].mxu1 %vm280_vm1, %v256_v58 }
  0xf5   :  { %v257_v1 = vmax.f32 %v211_v63, 0.0  ;;  %v858_v2 = vpop.f32.mrb[10].mxu0 }
  0xf6   :  { %v226_v3 = vadd.f32 %v858_v2, %v737_v35  ;;  %v220_v4 = vpop.f32.mrb[11].mxu0 }
  0xf7   :  { %v221_v5 = vadd.f32 %v737_v35, %v220_v4  ;;  %893 = vmatprep.mubr.msk.f32.mxu1 %vm280_vm1, %v257_v1 }
  0xf8   :  { %v260_v6 = vmax.f32 %v226_v3, 0.0  ;;  %894 = vmatmul.mubr.msk.f32.gmra.mrb[6].mxu1 %vm280_vm1, %v258_v0 }
  0xf9   :  { %v259_v7 = vmax.f32 %v221_v5, 0.0  ;;  %v861_v8 = vpop.f32.mrb[12].mxu0 }
  0xfa   :  { %v236_v9 = vadd.f32 %v861_v8, %v737_v35  ;;  %v230_v10 = vpop.f32.mrb[13].mxu0 }
  0xfb   :  { %v231_v11 = vadd.f32 %v737_v35, %v230_v10  ;;  %896 = vmatprep.mubr.msk.f32.mxu1 %vm280_vm1, %v259_v7 }
  0xfc   :  { %v262_v12 = vmax.f32 %v236_v9, 0.0  ;;  %897 = vmatmul.mubr.msk.f32.gmra.mrb[8].mxu1 %vm280_vm1, %v260_v6 }
  0xfd   :  { %v261_v13 = vmax.f32 %v231_v11, 0.0  ;;  %v864_v14 = vpop.f32.mrb[14].mxu0 }
  0xfe   :  { %v246_v15 = vadd.f32 %v864_v14, %v737_v35  ;;  %v240_v16 = vpop.f32.mrb[15].mxu0 }
  0xff   :  { %v241_v17 = vadd.f32 %v737_v35, %v240_v16  ;;  %899 = vmatprep.mubr.msk.f32.mxu1 %vm280_vm1, %v261_v13 }
 0x100   :  { %v264_v18 = vmax.f32 %v246_v15, 0.0  ;;  %900 = vmatmul.mubr.msk.f32.gmra.mrb[10].mxu1 %vm280_vm1, %v262_v12 }
 0x101   :  { %v263_v19 = vmax.f32 %v241_v17, 0.0 }
 0x103   :  { %902 = vmatprep.mubr.msk.f32.mxu1 %vm280_vm1, %v263_v19 }
 0x104   :  { %903 = vmatmul.mubr.msk.f32.gmra.mrb[12].mxu1 %vm280_vm1, %v264_v18 }
 0x1bb   :  { %v883_v21 = vpop.f32.mrb[16].mxu0 }
 0x1bc   :  { %v401_v22 = vadd.f32 %v883_v21, %v1166_v20  ;;  %v395_v23 = vpop.f32.mrb[17].mxu0 }
 0x1bd   :  { %v396_v24 = vadd.f32 %v1166_v20, %v395_v23 }
 0x1be   :  { %v475_v26 = vmax.f32 %v401_v22, 0.0 }
 0x1bf   :  { %v474_v27 = vmax.f32 %v396_v24, 0.0  ;;  %v886_v28 = vpop.f32.mrb[0].mxu1 }
 0x1c0   :  { %v411_v29 = vadd.f32 %v886_v28, %v1166_v20  ;;  %v405_v30 = vpop.f32.mrb[1].mxu1  ;;  %v498_v31 = vmul.f32 %v1173_v25, %v475_v26 }
 0x1c1   :  { %v406_v32 = vadd.f32 %v1166_v20, %v405_v30  ;;  %v497_v35 = vmul.f32 %v1173_v25, %v474_v27 }
 0x1c2   :  { %v477_v33 = vmax.f32 %v411_v29, 0.0  ;;  %v516_v34 = vsel %vm55_vm0, %v498_v31, 0.0 }
 0x1c3   :  { %v476_v36 = vmax.f32 %v406_v32, 0.0  ;;  %v889_v37 = vpop.f32.mrb[2].mxu1  ;;  %517 = vadd.xlane.f32.xlu0 %v516_v34  ;;  %v513_v44 = vsel %vm55_vm0, %v497_v35, 0.0 }
 0x1c4   :  { %v421_v38 = vadd.f32 %v889_v37, %v1166_v20  ;;  %v415_v39 = vpop.f32.mrb[3].mxu1  ;;  %v500_v40 = vmul.f32 %v1173_v25, %v477_v33 }
 0x1c5   :  { %v416_v41 = vadd.f32 %v1166_v20, %v415_v39  ;;  %v499_v45 = vmul.f32 %v1173_v25, %v476_v36  ;;  %v1221_v39 = vld [vmem:[#allocation2] ss:$0 sm:$0xff] }
 0x1c6   :  { %v479_v42 = vmax.f32 %v421_v38, 0.0  ;;  %v522_v43 = vsel %vm55_vm0, %v500_v40, 0.0 }
 0x1c7   :  { %v478_v46 = vmax.f32 %v416_v41, 0.0  ;;  %523 = vadd.xlane.f32.xlu1 %v522_v43  ;;  %v892_v47 = vpop.f32.mrb[4].mxu1  ;;  %514 = vadd.xlane.f32.xlu0 %v513_v44  ;;  %v519_v53 = vsel %vm55_vm0, %v499_v45, 0.0 }
 0x1c8   :  { %v431_v48 = vadd.f32 %v892_v47, %v1166_v20  ;;  %v425_v49 = vpop.f32.mrb[5].mxu1  ;;  %v502_v54 = vmul.f32 %v1173_v25, %v479_v42 }
 0x1c9   :  { %v426_v50 = vadd.f32 %v1166_v20, %v425_v49  ;;  %v501_v51 = vmul.f32 %v1173_v25, %v478_v46 }
 0x1ca   :  { %v481_v52 = vmax.f32 %v431_v48, 0.0  ;;  %v528_v63 = vsel %vm55_vm0, %v502_v54, 0.0 }
 0x1cb   :  { %v480_v55 = vmax.f32 %v426_v50, 0.0  ;;  %v895_v56 = vpop.f32.mrb[6].mxu1  ;;  %520 = vadd.xlane.f32.xlu1 %v519_v53  ;;  %v525_v57 = vsel %vm55_vm0, %v501_v51, 0.0 }
 0x1cc   :  { %v441_v58 = vadd.f32 %v895_v56, %v1166_v20  ;;  %v435_v59 = vpop.f32.mrb[7].mxu1  ;;  %526 = vadd.xlane.f32.xlu0 %v525_v57  ;;  %v504_v0 = vmul.f32 %v1173_v25, %v481_v52 }
 0x1cd   :  { %v436_v60 = vadd.f32 %v1166_v20, %v435_v59  ;;  %v503_v61 = vmul.f32 %v1173_v25, %v480_v55 }
 0x1ce   :  { %v483_v62 = vmax.f32 %v441_v58, 0.0  ;;  %v534_v9 = vsel %vm55_vm0, %v504_v0, 0.0 }
 0x1cf   :  { %v482_v1 = vmax.f32 %v436_v60, 0.0  ;;  %v898_v2 = vpop.f32.mrb[8].mxu1  ;;  %529 = vadd.xlane.f32.xlu1 %v528_v63  ;;  %v531_v3 = vsel %vm55_vm0, %v503_v61, 0.0 }
 0x1d0   :  { %v451_v4 = vadd.f32 %v898_v2, %v1166_v20  ;;  %v445_v5 = vpop.f32.mrb[9].mxu1  ;;  %532 = vadd.xlane.f32.xlu0 %v531_v3  ;;  %v506_v10 = vmul.f32 %v1173_v25, %v483_v62 }
 0x1d1   :  { %v446_v6 = vadd.f32 %v1166_v20, %v445_v5  ;;  %v505_v7 = vmul.f32 %v1173_v25, %v482_v1 }
 0x1d2   :  { %v485_v8 = vmax.f32 %v451_v4, 0.0  ;;  %v540_v19 = vsel %vm55_vm0, %v506_v10, 0.0 }
 0x1d3   :  { %v484_v11 = vmax.f32 %v446_v6, 0.0  ;;  %v901_v12 = vpop.f32.mrb[10].mxu1  ;;  %535 = vadd.xlane.f32.xlu1 %v534_v9  ;;  %v537_v13 = vsel %vm55_vm0, %v505_v7, 0.0 }
 0x1d4   :  { %v461_v14 = vadd.f32 %v901_v12, %v1166_v20  ;;  %v455_v15 = vpop.f32.mrb[11].mxu1  ;;  %538 = vadd.xlane.f32.xlu0 %v537_v13  ;;  %v508_v21 = vmul.f32 %v1173_v25, %v485_v8 }
 0x1d5   :  { %v456_v16 = vadd.f32 %v1166_v20, %v455_v15  ;;  %v507_v17 = vmul.f32 %v1173_v25, %v484_v11 }
 0x1d6   :  { %v487_v18 = vmax.f32 %v461_v14, 0.0  ;;  %v546_v31 = vsel %vm55_vm0, %v508_v21, 0.0 }
 0x1d7   :  { %v486_v22 = vmax.f32 %v456_v16, 0.0  ;;  %v904_v23 = vpop.f32.mrb[12].mxu1  ;;  %541 = vadd.xlane.f32.xlu1 %v540_v19  ;;  %v543_v24 = vsel %vm55_vm0, %v507_v17, 0.0 }
 0x1d8   :  { %v471_v26 = vadd.f32 %v904_v23, %v1166_v20  ;;  %v465_v27 = vpop.f32.mrb[13].mxu1  ;;  %544 = vadd.xlane.f32.xlu0 %v543_v24  ;;  %v510_v32 = vmul.f32 %v1173_v25, %v487_v18 }
 0x1d9   :  { %v466_v28 = vadd.f32 %v1166_v20, %v465_v27  ;;  %v509_v29 = vmul.f32 %v1173_v25, %v486_v22 }
 0x1da   :  { %v489_v30 = vmax.f32 %v471_v26, 0.0  ;;  %v552_v36 = vsel %vm55_vm0, %v510_v32, 0.0 }
 0x1db   :  { %v488_v33 = vmax.f32 %v466_v28, 0.0  ;;  %547 = vadd.xlane.f32.xlu1 %v546_v31  ;;  %v549_v34 = vsel %vm55_vm0, %v509_v29, 0.0 }
 0x1dc   :  { %550 = vadd.xlane.f32.xlu0 %v549_v34  ;;  %v512_v37 = vmul.f32 %v1173_v25, %v489_v30 }
 0x1dd   :  { %v511_v35 = vmul.f32 %v1173_v25, %v488_v33 }
 0x1de   :  { %v558_v38 = vsel %vm55_vm0, %v512_v37, 0.0 }
 0x1df   :  { %553 = vadd.xlane.f32.xlu1 %v552_v36  ;;  %v555_v20 = vsel %vm55_vm0, %v511_v35, 0.0 }
 0x1e0   :  { %556 = vadd.xlane.f32.xlu0 %v555_v20 }
 0x1e3   :  { %559 = vadd.xlane.f32.xlu1 %v558_v38 }
 0x250   :  { %v518_v40 = vpop.xlane.xlu0 %517 }
 0x251   :  { %v569_v41 = vadd.f32 %v1221_v39, %v518_v40 }
 0x253   :  { %v774_v42 = vmul.f32 -1.442695, %v569_v41 }
 0x254   :  { %v524_v43 = vpop.xlane.xlu1 %523  ;;  %v515_v44 = vpop.xlane.xlu0 %514 }
 0x255   :  { %937 = vpow2.f32 %v774_v42  ;;  %v571_v45 = vadd.f32 %v1221_v39, %v524_v43  ;;  %v568_v25 = vadd.f32 %v1221_v39, %v515_v44 }
 0x257   :  { %v776_v46 = vmul.f32 -1.442695, %v571_v45  ;;  %v773_v47 = vmul.f32 -1.442695, %v568_v25 }
 0x258   :  { %v521_v48 = vpop.xlane.xlu1 %520 }
 0x259   :  { %939 = vpow2.f32 %v776_v46  ;;  %v570_v49 = vadd.f32 %v1221_v39, %v521_v48  ;;  %v527_v50 = vpop.xlane.xlu0 %526 }
 0x25a   :  { %941 = vpow2.f32 %v773_v47  ;;  %v572_v51 = vadd.f32 %v1221_v39, %v527_v50 }
 0x25b   :  { %v775_v52 = vmul.f32 -1.442695, %v570_v49 }
 0x25c   :  { %v777_v53 = vmul.f32 -1.442695, %v572_v51  ;;  %v530_v54 = vpop.xlane.xlu1 %529 }
 0x25d   :  { %943 = vpow2.f32 %v775_v52  ;;  %v573_v55 = vadd.f32 %v1221_v39, %v530_v54  ;;  %v533_v56 = vpop.xlane.xlu0 %532 }
 0x25e   :  { %945 = vpow2.f32 %v777_v53  ;;  %v574_v57 = vadd.f32 %v1221_v39, %v533_v56 }
 0x25f   :  { %v938_v58 = vpop.eup %937  ;;  %v778_v59 = vmul.f32 -1.442695, %v573_v55 }
 0x260   :  { %v633_v60 = vadd.f32 1.0, %v938_v58  ;;  %v779_v61 = vmul.f32 -1.442695, %v574_v57  ;;  %v536_v62 = vpop.xlane.xlu1 %535 }
 0x261   :  { %947 = vpow2.f32 %v778_v59  ;;  %v575_v63 = vadd.f32 %v1221_v39, %v536_v62  ;;  %v539_v0 = vpop.xlane.xlu0 %538 }
 0x262   :  { %949 = vrcp.f32 %v633_v60  ;;  %v576_v1 = vadd.f32 %v1221_v39, %v539_v0 }
 0x263   :  { %v940_v2 = vpop.eup %939  ;;  %951 = vpow2.f32 %v779_v61  ;;  %v780_v3 = vmul.f32 -1.442695, %v575_v63 }
 0x264   :  { %v942_v4 = vpop.eup %941  ;;  %v635_v5 = vadd.f32 1.0, %v940_v2  ;;  %v781_v6 = vmul.f32 -1.442695, %v576_v1  ;;  %v542_v7 = vpop.xlane.xlu1 %541 }
 0x265   :  { %v632_v8 = vadd.f32 1.0, %v942_v4  ;;  %953 = vpow2.f32 %v780_v3  ;;  %v577_v9 = vadd.f32 %v1221_v39, %v542_v7  ;;  %v545_v10 = vpop.xlane.xlu0 %544 }
 0x266   :  { %955 = vrcp.f32 %v635_v5  ;;  %v578_v11 = vadd.f32 %v1221_v39, %v545_v10 }
 0x267   :  { %v944_v12 = vpop.eup %943  ;;  %957 = vrcp.f32 %v632_v8  ;;  %v782_v13 = vmul.f32 -1.442695, %v577_v9 }
 0x268   :  { %v946_v14 = vpop.eup %945  ;;  %v634_v15 = vadd.f32 1.0, %v944_v12  ;;  %959 = vpow2.f32 %v781_v6  ;;  %v783_v16 = vmul.f32 -1.442695, %v578_v11  ;;  %v548_v17 = vpop.xlane.xlu1 %547 }
 0x269   :  { %v636_v18 = vadd.f32 1.0, %v946_v14  ;;  %961 = vpow2.f32 %v782_v13  ;;  %v579_v19 = vadd.f32 %v1221_v39, %v548_v17  ;;  %v551_v21 = vpop.xlane.xlu0 %550 }
 0x26a   :  { %963 = vrcp.f32 %v634_v15  ;;  %v580_v22 = vadd.f32 %v1221_v39, %v551_v21 }
 0x26b   :  { %v948_v23 = vpop.eup %947  ;;  %965 = vrcp.f32 %v636_v18  ;;  %v784_v24 = vmul.f32 -1.442695, %v579_v19 }
 0x26c   :  { %v950_v26 = vpop.eup %949  ;;  %v637_v27 = vadd.f32 1.0, %v948_v23  ;;  %967 = vpow2.f32 %v783_v16  ;;  %v785_v28 = vmul.f32 -1.442695, %v580_v22  ;;  %v554_v29 = vpop.xlane.xlu1 %553 }
 0x26d   :  { %v952_v30 = vpop.eup %951  ;;  %969 = vpow2.f32 %v784_v24  ;;  %v581_v31 = vadd.f32 %v1221_v39, %v554_v29  ;;  %v557_v32 = vpop.xlane.xlu0 %556 }
 0x26e   :  { %971 = vrcp.f32 %v637_v27  ;;  %v638_v33 = vadd.f32 1.0, %v952_v30  ;;  %v582_v34 = vadd.f32 %v1221_v39, %v557_v32 }
 0x26f   :  { %v954_v35 = vpop.eup %953  ;;  %973 = vpow2.f32 %v785_v28  ;;  %v786_v36 = vmul.f32 -1.442695, %v581_v31 }
 0x270   :  { %v956_v37 = vpop.eup %955  ;;  %975 = vrcp.f32 %v638_v33  ;;  %v639_v20 = vadd.f32 1.0, %v954_v35  ;;  %v787_v38 = vmul.f32 -1.442695, %v582_v34  ;;  %v560_v40 = vpop.xlane.xlu1 %559 }
 0x271   :  { %v958_v41 = vpop.eup %957  ;;  %977 = vpow2.f32 %v786_v36  ;;  %v583_v42 = vadd.f32 %v1221_v39, %v560_v40 }
 0x272   :  { %v960_v43 = vpop.eup %959  ;;  %681 = vst.msk [vmem:[#allocation3] sm:$0xff] %vm680_vm2, %v958_v41  ;;  %979 = vrcp.f32 %v639_v20 }
 0x273   :  { %v962_v44 = vpop.eup %961  ;;  %v640_v45 = vadd.f32 1.0, %v960_v43  ;;  %981 = vpow2.f32 %v787_v38  ;;  %v788_v25 = vmul.f32 -1.442695, %v583_v42 }
 0x274   :  { %v964_v46 = vpop.eup %963  ;;  %v641_v47 = vadd.f32 1.0, %v962_v44 }
 0x275   :  { %v966_v48 = vpop.eup %965  ;;  %983 = vrcp.f32 %v640_v45 }
 0x276   :  { %v968_v49 = vpop.eup %967  ;;  %985 = vrcp.f32 %v641_v47 }
 0x277   :  { %v970_v50 = vpop.eup %969  ;;  %v642_v51 = vadd.f32 1.0, %v968_v49  ;;  %987 = vpow2.f32 %v788_v25 }
 0x278   :  { %v972_v52 = vpop.eup %971  ;;  %v643_v53 = vadd.f32 1.0, %v970_v50 }
 0x279   :  { %v974_v39 = vpop.eup %973  ;;  %v726_v54 = vld [vmem:[#allocation3] sm:$0xff]  ;;  %989 = vrcp.f32 %v642_v51 }
 0x27a   :  { %v976_v55 = vpop.eup %975  ;;  %727 = vst [vmem:[%s1250_s7] sm:$0xff] %v726_v54  ;;  %991 = vrcp.f32 %v643_v53  ;;  %v644_v56 = vadd.f32 1.0, %v974_v39 }
 0x27b   :  { %v978_v57 = vpop.eup %977 }
 0x27c   :  { %v980_v58 = vpop.eup %979  ;;  %993 = vrcp.f32 %v644_v56  ;;  %v645_v59 = vadd.f32 1.0, %v978_v57 }
 0x27d   :  { %v982_v60 = vpop.eup %981 }
 0x27e   :  { %995 = vrcp.f32 %v645_v59  ;;  %v646_v61 = vadd.f32 1.0, %v982_v60 }
 0x27f   :  { %v984_v62 = vpop.eup %983 }
 0x280   :  { %v986_v63 = vpop.eup %985  ;;  %997 = vrcp.f32 %v646_v61 }
 0x281   :  { %v988_v0 = vpop.eup %987 }
 0x282   :  { %v647_v1 = vadd.f32 1.0, %v988_v0 }
 0x283   :  { %v990_v2 = vpop.eup %989 }
 0x284   :  { %v992_v3 = vpop.eup %991  ;;  %999 = vrcp.f32 %v647_v1 }
 0x286   :  { %v994_v4 = vpop.eup %993 }
 0x288   :  { %v996_v5 = vpop.eup %995 }
 0x28a   :  { %v998_v6 = vpop.eup %997 }
 0x28e   :  { %v1000_v7 = vpop.eup %999 }

</bundles_post_ra>
